<compile_context>
chip_gen: v6e
topology: v6e:2x2x1
jax: 0.10.0
libtpu: 0.0.40
codegen_flags: <defaults>
</compile_context>

<pallas_src>
import functools

import jax
import jax.numpy as jnp
from jax import lax
from jax.experimental import pallas as pl
from jax.experimental.pallas import tpu as pltpu


# ----------------------------------------------------------------------------
# Fused MLP kernel: whole network per batch tile, processed in lane chunks
# ----------------------------------------------------------------------------
def _fused_mlp_kernel(x_ref, *refs, n_layers, chunk, n_chunks):
    # x_ref : (in0, tm)           -- batch along lanes
    # refs  : w0, b0, w1, b1, ..., w_{L-1}, b_{L-1}, o_ref
    #         w_l : (out_l, in_l) (native torch layout), b_l : (out_l, 1)
    # o_ref : (out_final, tm)
    o_ref = refs[-1]
    wb = refs[:-1]

    def run_chunk(col_slice):
        a = x_ref[:, col_slice]                       # (in0, chunk) f32
        for li in range(n_layers):                    # static unroll over layers
            w = wb[2 * li][...]                       # (out, in)
            b = wb[2 * li + 1][...]                   # (out, 1)
            out_f, in_f = w.shape
            if in_f <= 4:
                # Tiny contraction dim (the (x, z) input layer): VPU
                # broadcast multiply-adds instead of a wasted MXU pass.
                y = w[:, 0:1] * a[0:1, :]             # (out, chunk)
                for kk in range(1, in_f):
                    y = y + w[:, kk:kk + 1] * a[kk:kk + 1, :]
                y = y + b
            else:
                y = jnp.dot(w, a, preferred_element_type=jnp.float32) + b
            if li < n_layers - 1:
                y = jnp.tanh(y)                       # EUP slot
            a = y
        o_ref[:, col_slice] = a.astype(o_ref.dtype)

    if n_chunks == 1:
        run_chunk(slice(None))                        # whole tile at once
    else:
        def body(c, carry):
            col = pl.multiple_of(c * chunk, chunk)
            run_chunk(pl.ds(col, chunk))
            return carry
        lax.fori_loop(0, n_chunks, body, 0)


# ----------------------------------------------------------------------------
# Tile / chunk selection
# ----------------------------------------------------------------------------
def _choose_tile(M, max_tile):
    """Balanced 128-multiple batch tiles; >= 2 tiles whenever M > 256 so the
    'parallel' grid axis can shard across v7x's two TensorCores."""
    if M <= 256:
        return M                                     # single (possibly ragged) tile
    n_tiles = max(2, pl.cdiv(M, max_tile))
    if n_tiles % 2:
        n_tiles += 1                                 # even tile count for 2 TCs
    return pl.cdiv(pl.cdiv(M, n_tiles), 128) * 128


def _choose_chunk(tm):
    """Lane-chunk width for the in-kernel loop (bounds vreg pressure)."""
    for c in (256, 128):
        if tm % c == 0:
            return c
    return tm                                        # ragged small tile: no chunking


# ----------------------------------------------------------------------------
# Core entry point: transposed layout, zero wrapper-side HBM passes
# ----------------------------------------------------------------------------
def dnn_forward_t(xt, params, *, max_tile=8192):
    """Forward pass on transposed inputs.

    xt     : (in0, M) float32  -- coordinates stacked as rows (batch on lanes)
    params : list of (W, b), W shaped (out_features, in_features) (torch
             nn.Linear layout), b shaped (out_features,).
    Returns (out_final, M) float32.
    """
    in0, M = xt.shape
    n_layers = len(params)
    out_final = params[-1][0].shape[0]

    tm = _choose_tile(M, max_tile)
    chunk = _choose_chunk(tm)
    n_chunks = tm // chunk
    grid = (pl.cdiv(M, tm),)                          # boundary block: masked tail

    # TODO(synk): optionally pack the 8 weight/bias operands into one padded
    # slab to shave per-step index-map/DMA bookkeeping (few-% item).
    flat_params = []
    in_specs = [pl.BlockSpec((in0, tm), lambda i: (0, i))]   # batch tile of x
    for (w, b) in params:
        out_f, in_f = w.shape
        flat_params.append(w)
        flat_params.append(b.reshape(out_f, 1))
        # Constant index_map -> weights/biases DMA'd once, resident in VMEM.
        in_specs.append(pl.BlockSpec((out_f, in_f), lambda i: (0, 0)))
        in_specs.append(pl.BlockSpec((out_f, 1), lambda i: (0, 0)))

    kernel = functools.partial(_fused_mlp_kernel, n_layers=n_layers,
                               chunk=chunk, n_chunks=n_chunks)

    return pl.pallas_call(
        kernel,
        out_shape=jax.ShapeDtypeStruct((out_final, M), jnp.float32),
        grid_spec=pltpu.PrefetchScalarGridSpec(
            num_scalar_prefetch=0,
            grid=grid,
            in_specs=in_specs,
            # Lane-dense output: batch on the 128-wide lane axis.
            out_specs=pl.BlockSpec((out_final, tm), lambda i: (0, i)),
        ),
        compiler_params=pltpu.CompilerParams(
            dimension_semantics=("parallel",)),       # megacore sharding on v7x
    )(xt, *flat_params)


# ----------------------------------------------------------------------------
# Torch-API-compatible wrapper (matches nn.Module.forward semantics)
# ----------------------------------------------------------------------------
def dnn_forward(x, params, *, max_tile=8192):
    """x: (M, in0) -> (M, out_final), identical to the torch Sequential.
    For large PINN collocation batches, build coordinates as (in0, M) and call
    `dnn_forward_t` directly to avoid the input-transpose HBM pass."""
    return dnn_forward_t(x.T, params, max_tile=max_tile).T


# ----------------------------------------------------------------------------
# Param init (mirrors torch.nn.Linear defaults) and pure-JAX reference
# ----------------------------------------------------------------------------
def init_dnn_params(layers, key):
    """U(-1/sqrt(fan_in), 1/sqrt(fan_in)) for weights and biases,
    weights stored torch-style as (out_features, in_features)."""
    params = []
    for i in range(len(layers) - 1):
        fan_in, fan_out = layers[i], layers[i + 1]
        key, kw, kb = jax.random.split(key, 3)
        bound = 1.0 / jnp.sqrt(jnp.float32(fan_in))
        w = jax.random.uniform(kw, (fan_out, fan_in), jnp.float32,
                               minval=-bound, maxval=bound)
        b = jax.random.uniform(kb, (fan_out,), jnp.float32,
                               minval=-bound, maxval=bound)
        params.append((w, b))
    return params


def dnn_forward_ref(x, params):
    """Pure-JAX reference (matches the PyTorch Sequential exactly)."""
    n_layers = len(params)
    out = x
    for li, (w, b) in enumerate(params):
        out = out @ w.T + b
        if li < n_layers - 1:
            out = jnp.tanh(out)
    return out


if __name__ == "__main__":
    # PINN-style MLP: (x, z) -> scalar field.
    layers = [2, 32, 32, 32, 1]

    key = jax.random.PRNGKey(0)
    key, k1, k2 = jax.random.split(key, 3)
    params = init_dnn_params(layers, key)

    # 1) Small batch via the torch-compatible API (single-tile path).
    x = jax.random.normal(k1, (64, layers[0]), dtype=jnp.float32)
    out = jax.block_until_ready(dnn_forward(x, params))
    ref = dnn_forward_ref(x, params)
    assert out.shape == (64, layers[-1]), out.shape
    assert jnp.allclose(out, ref, atol=1e-5, rtol=1e-5), (
        float(jnp.max(jnp.abs(out - ref))))

    # 2) Ragged batch via the transposed API: balanced multi-tile grid
    #    (>= 2 tiles for v7x megacore), boundary last block with masked tail
    #    writes, and the in-kernel lane-chunk loop (tm=384, chunk=128).
    xt = jax.random.normal(k2, (layers[0], 600), dtype=jnp.float32)
    out_t = jax.block_until_ready(dnn_forward_t(xt, params, max_tile=512))
    ref_t = dnn_forward_ref(xt.T, params).T
    assert out_t.shape == (layers[-1], 600), out_t.shape
    assert jnp.allclose(out_t, ref_t, atol=1e-5, rtol=1e-5), (
        float(jnp.max(jnp.abs(out_t - ref_t))))

    print("KERNEL_OK")
</pallas_src>

<mosaic_0001>
module attributes {stable_mosaic.version = 11 : i64} {
  func.func @_fused_mlp_kernel(%arg0: i32, %arg1: memref<2x64xf32, #tpu.memory_space<vmem>>, %arg2: memref<32x2xf32, #tpu.memory_space<vmem>>, %arg3: memref<32x1xf32, #tpu.memory_space<vmem>>, %arg4: memref<32x32xf32, #tpu.memory_space<vmem>>, %arg5: memref<32x1xf32, #tpu.memory_space<vmem>>, %arg6: memref<32x32xf32, #tpu.memory_space<vmem>>, %arg7: memref<32x1xf32, #tpu.memory_space<vmem>>, %arg8: memref<1x32xf32, #tpu.memory_space<vmem>>, %arg9: memref<1x1xf32, #tpu.memory_space<vmem>>, %arg10: memref<1x64xf32, #tpu.memory_space<vmem>>) attributes {dimension_semantics = [#tpu.dimension_semantics<parallel>], iteration_bounds = array<i64: 1>, scalar_prefetch = 0 : i64, scratch_operands = 0 : i64, tpu.core_type = #tpu.core_type<tc>, window_params = [{transform_indices = @transform_0, window_bounds = array<i64: 2, 64>}, {pipeline_mode = #tpu.pipeline_mode<synchronous>, transform_indices = @transform_1, window_bounds = array<i64: 32, 2>}, {pipeline_mode = #tpu.pipeline_mode<synchronous>, transform_indices = @transform_2, window_bounds = array<i64: 32, 1>}, {pipeline_mode = #tpu.pipeline_mode<synchronous>, transform_indices = @transform_3, window_bounds = array<i64: 32, 32>}, {pipeline_mode = #tpu.pipeline_mode<synchronous>, transform_indices = @transform_4, window_bounds = array<i64: 32, 1>}, {pipeline_mode = #tpu.pipeline_mode<synchronous>, transform_indices = @transform_5, window_bounds = array<i64: 32, 32>}, {pipeline_mode = #tpu.pipeline_mode<synchronous>, transform_indices = @transform_6, window_bounds = array<i64: 32, 1>}, {pipeline_mode = #tpu.pipeline_mode<synchronous>, transform_indices = @transform_7, window_bounds = array<i64: 1, 32>}, {pipeline_mode = #tpu.pipeline_mode<synchronous>, transform_indices = @transform_8, window_bounds = array<i64: 1, 1>}, {transform_indices = @transform_9, window_bounds = array<i64: 1, 64>}]} {
    %c0 = arith.constant 0 : index
    %c0_0 = arith.constant 0 : index
    %0 = vector.load %arg1[%c0, %c0_0] : memref<2x64xf32, #tpu.memory_space<vmem>>, vector<2x64xf32>
    %c0_1 = arith.constant 0 : index
    %c0_2 = arith.constant 0 : index
    %1 = vector.load %arg2[%c0_1, %c0_2] : memref<32x2xf32, #tpu.memory_space<vmem>>, vector<32x2xf32>
    %c0_3 = arith.constant 0 : index
    %c0_4 = arith.constant 0 : index
    %2 = vector.load %arg3[%c0_3, %c0_4] : memref<32x1xf32, #tpu.memory_space<vmem>>, vector<32x1xf32>
    %3 = vector.extract_strided_slice %1 {offsets = [0, 0], sizes = [32, 1], strides = [1, 1]} : vector<32x2xf32> to vector<32x1xf32>
    %4 = vector.extract_strided_slice %0 {offsets = [0, 0], sizes = [1, 64], strides = [1, 1]} : vector<2x64xf32> to vector<1x64xf32>
    %5 = vector.broadcast %3 : vector<32x1xf32> to vector<32x64xf32>
    %6 = vector.broadcast %4 : vector<1x64xf32> to vector<32x64xf32>
    %7 = arith.mulf %5, %6 : vector<32x64xf32>
    %8 = vector.extract_strided_slice %1 {offsets = [0, 1], sizes = [32, 1], strides = [1, 1]} : vector<32x2xf32> to vector<32x1xf32>
    %9 = vector.extract_strided_slice %0 {offsets = [1, 0], sizes = [1, 64], strides = [1, 1]} : vector<2x64xf32> to vector<1x64xf32>
    %10 = vector.broadcast %8 : vector<32x1xf32> to vector<32x64xf32>
    %11 = vector.broadcast %9 : vector<1x64xf32> to vector<32x64xf32>
    %12 = arith.mulf %10, %11 : vector<32x64xf32>
    %13 = arith.addf %7, %12 : vector<32x64xf32>
    %14 = vector.broadcast %2 : vector<32x1xf32> to vector<32x64xf32>
    %15 = arith.addf %13, %14 : vector<32x64xf32>
    %16 = math.tanh %15 : vector<32x64xf32>
    %c0_5 = arith.constant 0 : index
    %c0_6 = arith.constant 0 : index
    %17 = vector.load %arg4[%c0_5, %c0_6] : memref<32x32xf32, #tpu.memory_space<vmem>>, vector<32x32xf32>
    %c0_7 = arith.constant 0 : index
    %c0_8 = arith.constant 0 : index
    %18 = vector.load %arg5[%c0_7, %c0_8] : memref<32x1xf32, #tpu.memory_space<vmem>>, vector<32x1xf32>
    %cst = arith.constant dense<0.000000e+00> : vector<32x64xf32>
    %19 = tpu.matmul %17, %16, %cst {dimension_numbers = #tpu.dot_dimension_numbers<[1], [0], [0], [1], [0, 0, 1, 1], [], []>} : vector<32x32xf32>, vector<32x64xf32>, vector<32x64xf32> -> vector<32x64xf32>
    %20 = vector.broadcast %18 : vector<32x1xf32> to vector<32x64xf32>
    %21 = arith.addf %19, %20 : vector<32x64xf32>
    %22 = math.tanh %21 : vector<32x64xf32>
    %c0_9 = arith.constant 0 : index
    %c0_10 = arith.constant 0 : index
    %23 = vector.load %arg6[%c0_9, %c0_10] : memref<32x32xf32, #tpu.memory_space<vmem>>, vector<32x32xf32>
    %c0_11 = arith.constant 0 : index
    %c0_12 = arith.constant 0 : index
    %24 = vector.load %arg7[%c0_11, %c0_12] : memref<32x1xf32, #tpu.memory_space<vmem>>, vector<32x1xf32>
    %cst_13 = arith.constant dense<0.000000e+00> : vector<32x64xf32>
    %25 = tpu.matmul %23, %22, %cst_13 {dimension_numbers = #tpu.dot_dimension_numbers<[1], [0], [0], [1], [0, 0, 1, 1], [], []>} : vector<32x32xf32>, vector<32x64xf32>, vector<32x64xf32> -> vector<32x64xf32>
    %26 = vector.broadcast %24 : vector<32x1xf32> to vector<32x64xf32>
    %27 = arith.addf %25, %26 : vector<32x64xf32>
    %28 = math.tanh %27 : vector<32x64xf32>
    %c0_14 = arith.constant 0 : index
    %c0_15 = arith.constant 0 : index
    %29 = vector.load %arg8[%c0_14, %c0_15] : memref<1x32xf32, #tpu.memory_space<vmem>>, vector<1x32xf32>
    %c0_16 = arith.constant 0 : index
    %c0_17 = arith.constant 0 : index
    %30 = vector.load %arg9[%c0_16, %c0_17] : memref<1x1xf32, #tpu.memory_space<vmem>>, vector<1x1xf32>
    %cst_18 = arith.constant dense<0.000000e+00> : vector<1x64xf32>
    %31 = tpu.matmul %29, %28, %cst_18 {dimension_numbers = #tpu.dot_dimension_numbers<[1], [0], [0], [1], [0, 0, 1, 1], [], []>} : vector<1x32xf32>, vector<32x64xf32>, vector<1x64xf32> -> vector<1x64xf32>
    %32 = vector.broadcast %30 : vector<1x1xf32> to vector<1x64xf32>
    %33 = arith.addf %31, %32 : vector<1x64xf32>
    %c0_19 = arith.constant 0 : index
    %c0_20 = arith.constant 0 : index
    %34 = vector.load %arg10[%c0_19, %c0_20] : memref<1x64xf32, #tpu.memory_space<vmem>>, vector<1x64xf32>
    tpu.vector_store %arg10[%c0_19, %c0_20], %33 {strides = array<i32>} : memref<1x64xf32, #tpu.memory_space<vmem>>, vector<1x64xf32>,
    return
  }
  func.func @transform_0(%arg0: i32) -> (i32, i32) {
    %c0_i32 = arith.constant 0 : i32
    %c0_i32_0 = arith.constant 0 : i32
    return %c0_i32, %arg0 : i32, i32
  }
  func.func @transform_1(%arg0: i32) -> (i32, i32) {
    %c0_i32 = arith.constant 0 : i32
    %c0_i32_0 = arith.constant 0 : i32
    %c0_i32_1 = arith.constant 0 : i32
    return %c0_i32, %c0_i32_0 : i32, i32
  }
  func.func @transform_2(%arg0: i32) -> (i32, i32) {
    %c0_i32 = arith.constant 0 : i32
    %c0_i32_0 = arith.constant 0 : i32
    %c0_i32_1 = arith.constant 0 : i32
    return %c0_i32, %c0_i32_0 : i32, i32
  }
  func.func @transform_3(%arg0: i32) -> (i32, i32) {
    %c0_i32 = arith.constant 0 : i32
    %c0_i32_0 = arith.constant 0 : i32
    %c0_i32_1 = arith.constant 0 : i32
    return %c0_i32, %c0_i32_0 : i32, i32
  }
  func.func @transform_4(%arg0: i32) -> (i32, i32) {
    %c0_i32 = arith.constant 0 : i32
    %c0_i32_0 = arith.constant 0 : i32
    %c0_i32_1 = arith.constant 0 : i32
    return %c0_i32, %c0_i32_0 : i32, i32
  }
  func.func @transform_5(%arg0: i32) -> (i32, i32) {
    %c0_i32 = arith.constant 0 : i32
    %c0_i32_0 = arith.constant 0 : i32
    %c0_i32_1 = arith.constant 0 : i32
    return %c0_i32, %c0_i32_0 : i32, i32
  }
  func.func @transform_6(%arg0: i32) -> (i32, i32) {
    %c0_i32 = arith.constant 0 : i32
    %c0_i32_0 = arith.constant 0 : i32
    %c0_i32_1 = arith.constant 0 : i32
    return %c0_i32, %c0_i32_0 : i32, i32
  }
  func.func @transform_7(%arg0: i32) -> (i32, i32) {
    %c0_i32 = arith.constant 0 : i32
    %c0_i32_0 = arith.constant 0 : i32
    %c0_i32_1 = arith.constant 0 : i32
    return %c0_i32, %c0_i32_0 : i32, i32
  }
  func.func @transform_8(%arg0: i32) -> (i32, i32) {
    %c0_i32 = arith.constant 0 : i32
    %c0_i32_0 = arith.constant 0 : i32
    %c0_i32_1 = arith.constant 0 : i32
    return %c0_i32, %c0_i32_0 : i32, i32
  }
  func.func @transform_9(%arg0: i32) -> (i32, i32) {
    %c0_i32 = arith.constant 0 : i32
    %c0_i32_0 = arith.constant 0 : i32
    return %c0_i32, %arg0 : i32, i32
  }
}

</mosaic_0001>

<bundles_post_ra>
// kernel: tpu_custom_call.1
= control target key start
LH: loop header
LB: loop body
LE: loop exit
PB: predicated region body
PF: predicated region fallthrough
CT: control target
= control target key end

     0   :  { %s770_s0 = inlined_call_operand.vmem [shape: f32[2,64], index: 0, kind: input, shape index: {}]   ;;  %s771_s1 = inlined_call_operand.vmem [shape: f32[32,2], index: 1, kind: input, shape index: {}]   ;;  %s772_s2 = inlined_call_operand.vmem [shape: f32[32,1], index: 2, kind: input, shape index: {}]   ;;  %s773_s3 = inlined_call_operand.vmem [shape: f32[32,32], index: 3, kind: input, shape index: {}]   ;;  %s774_s4 = inlined_call_operand.vmem [shape: f32[32,1], index: 4, kind: input, shape index: {}]   ;;  %s775_s5 = inlined_call_operand.vmem [shape: f32[32,32], index: 5, kind: input, shape index: {}]   ;;  %s776_s6 = inlined_call_operand.vmem [shape: f32[32,1], index: 6, kind: input, shape index: {}]   ;;  %s777_s7 = inlined_call_operand.vmem [shape: f32[1,32], index: 7, kind: input, shape index: {}]   ;;  %s778_s8 = inlined_call_operand.<no memory space> [shape: f32[1,1], index: 8, kind: input, shape index: {}]   ;;  %s779_s9 = inlined_call_operand.hbm [shape: f32[1,64], index: 9, kind: output, shape index: {}]  }
   0x1   :  { %v14_v0 = vstv %s778_s8 }
   0x2   :  { %15 = vst [vmem:[#allocation2] sm:$0x1] %v14_v0 }
   0x3   :  { %v39_v1 = vld [vmem:[%s771_s1 + $0x18] sm:$0xff]  ;;  %v38_v2 = vld [vmem:[%s771_s1 + $0x10] sm:$0xff]  ;;  %v614_v3 = vmov 1   ;;  %v615_v4 = vmov 0   ;;  %v37_v5 = vld [vmem:[%s771_s1 + $0x8] sm:$0xff] }
   0x4   :  { %561 = vset.pattern.permute.xlu0 %v614_v3  ;;  %562 = vset.pattern.permute.xlu1 %v615_v4 }
   0x5   :  { %85 = vperm.xlu0 %561, %v39_v1   ;;  %56 = vperm.xlu1 %562, %v38_v2  }
   0x9   :  { %563 = vset.pattern.permute.xlu1 %v614_v3  ;;  %77 = vperm.xlu0 %561, %v37_v5  }
   0xa   :  { %16 = vsyncpa [#allocation4], 0  ;;  %81 = vperm.xlu1 %563, %v38_v2   ;;  %v36_v6 = vld [vmem:[%s771_s1] sm:$0xff]  ;;  %v43_v7 = vld [vmem:[%s772_s2 + $0x18] sm:$0xff]  ;;  %vm156_vm0 = vcmask 261120   ;;  %v64_v21 = vlaneseq  ;;  %vm617_vm1 = vmmov 0  }
   0xb   :  { %v41_v8 = vld [vmem:[%s772_s2 + $0x8] sm:$0xff]  ;;  %v135_v9 = vld [vmem:[%s774_s4 + $0x18] sm:$0xff]  ;;  %v42_v10 = vld [vmem:[%s772_s2 + $0x10] sm:$0xff]  ;;  %s618_s11 = smov [#allocation3]   ;;  %vm471_vm2 = vcmask 516096  }
   0xc   :  { %v133_v11 = vld [vmem:[%s774_s4 + $0x8] sm:$0xff]  ;;  %v40_v12 = vld [vmem:[%s772_s2] sm:$0xff]  ;;  %v265_v13 = vld [vmem:[%s776_s6 + $0x18] sm:$0xff]  ;;  %v724_v22 = vshrl.u32 %v64_v21, 7  ;;  %s479_s12 = sshll.u32 %s618_s11, 4  ;;  %s480_s12 = int_to_ptr.vmem [resolvable:$true] %s479_s12 }
   0xd   :  { %565 = vset.pattern.permute.xlu0 %v615_v4  ;;  %v134_v14 = vld [vmem:[%s774_s4 + $0x10] sm:$0xff]  ;;  %v263_v15 = vld [vmem:[%s776_s6 + $0x8] sm:$0xff]  ;;  %v132_v16 = vld [vmem:[%s774_s4] sm:$0xff]  ;;  %s592_s13 = scalar_lea.vmem %s480_s12, 16  ;;  %p597_p1 = scmp.lt.s32.totalorder %s480_s12, %s480_s12 }
   0xe   :  { %564 = vset.pattern.permute.xlu1 %v615_v4  ;;  %61 = vperm.xlu0 %565, %v39_v1   ;;  %v388_v17 = vld [vmem:[#allocation2] sm:$0x1]  ;;  %v264_v18 = vld [vmem:[%s776_s6 + $0x10] sm:$0xff]  ;;  %v90_v25 = vsub.s32 1, %v724_v22  ;;  %v66_v26 = vsub.s32 0, %v724_v22  ;;  %v129_v60 = vld [vmem:[%s773_s3 + $0x8] sm:$0xff]  ;;  %p593_p0 = scmp.ne.s32.totalorder %s480_s12, %s592_s13 }
   0xf   :  { %51 = vperm.xlu1 %564, %v37_v5   ;;  %v128_v19 = vld [vmem:[%s773_s3] sm:$0xff]  ;;  %v130_v61 = vld [vmem:[%s773_s3 + $0x10] sm:$0xff]  ;;  %v131_v62 = vld [vmem:[%s773_s3 + $0x18] sm:$0xff] }
  0x10   :  { %v262_v20 = vld [vmem:[%s776_s6] sm:$0xff]  ;;  %525 = vmatprep.mubr.msk.f32.mxu0 %vm156_vm0, %v128_v19  ;;  %v616_v19 = vmov 0.0  }
  0x11   :  { %v35_v28 = vld [vmem:[%s770_s0] sm:$0x3] }
  0x12   :  { %46 = vperm.xlu0 %565, %v36_v6   ;;  %v91_v30 = vrot.slane %v35_v28, %v90_v25  ;;  %v67_v31 = vrot.slane %v35_v28, %v66_v26  ;;  %v258_v63 = vld [vmem:[%s775_s5] sm:$0xff] }
  0x13   :  { %117 = vperm.xlu1 %564, %v43_v7   ;;  %539 = vmatprep.mubr.msk.f32.mxu1 %vm156_vm0, %v258_v63 }
  0x16   :  { %107 = vperm.xlu0 %565, %v41_v8  }
  0x17   :  { %566 = vset.pattern.permute.xlu1 %v614_v3 }
  0x18   :  { %73 = vperm.xlu1 %566, %v36_v6  }
  0x1a   :  { %153 = vperm.xlu0 %565, %v135_v9  }
  0x1c   :  { %567 = vset.pattern.permute.xlu1 %v615_v4 }
  0x1d   :  { %112 = vperm.xlu1 %567, %v42_v10  }
  0x1e   :  { %143 = vperm.xlu0 %565, %v133_v11  }
  0x21   :  { %102 = vperm.xlu1 %567, %v40_v12  }
  0x22   :  { %283 = vperm.xlu0 %565, %v265_v13  }
  0x25   :  { %148 = vperm.xlu1 %567, %v134_v14  }
  0x26   :  { %273 = vperm.xlu0 %565, %v263_v15  }
  0x29   :  { %138 = vperm.xlu1 %567, %v132_v16   ;;  %v259_v16 = vld [vmem:[%s775_s5 + $0x8] sm:$0xff] }
  0x2a   :  { %391 = vperm.xlu0 %565, %v388_v17   ;;  %v260_v17 = vld [vmem:[%s775_s5 + $0x10] sm:$0xff] }
  0x2d   :  { %278 = vperm.xlu1 %567, %v264_v18   ;;  %v261_v18 = vld [vmem:[%s775_s5 + $0x18] sm:$0xff] }
  0x31   :  { %268 = vperm.xlu1 %567, %v262_v20  }
  0x80   :  { %v57_v23 = vpop.permute.xlu1 %56  ;;  %v86_v24 = vpop.permute.xlu0 %85 }
  0x81   :  { %v95_v32 = vmul.f32 %v91_v30, %v86_v24  ;;  %v70_v44 = vmul.f32 %v67_v31, %v57_v23 }
  0x84   :  { %v78_v27 = vpop.permute.xlu0 %77 }
  0x85   :  { %v82_v29 = vpop.permute.xlu1 %81  ;;  %v93_v41 = vmul.f32 %v91_v30, %v78_v27 }
  0x86   :  { %v94_v40 = vmul.f32 %v91_v30, %v82_v29 }
  0x88   :  { %v98_v49 = vadd.f32 %v94_v40, %v70_v44 }
  0x89   :  { %v62_v33 = vpop.permute.xlu0 %61 }
  0x8a   :  { %v71_v34 = vmul.f32 %v67_v31, %v62_v33  ;;  %v52_v35 = vpop.permute.xlu1 %51 }
  0x8b   :  { %v69_v42 = vmul.f32 %v67_v31, %v52_v35 }
  0x8c   :  { %v99_v36 = vadd.f32 %v95_v32, %v71_v34 }
  0x8d   :  { %v47_v39 = vpop.permute.xlu0 %46  ;;  %v97_v47 = vadd.f32 %v93_v41, %v69_v42 }
  0x8e   :  { %v118_v37 = vpop.permute.xlu1 %117  ;;  %v68_v46 = vmul.f32 %v67_v31, %v47_v39 }
  0x8f   :  { %v123_v38 = vadd.f32 %v118_v37, %v99_v36  ;;  %v387_v37 = vld [vmem:[%s777_s7] sm:$0x1]  ;;  %s596_s7 = scalar_lea.vmem %s480_s12, 32 }
  0x90   :  { %p598_p2 = scmp.lt.s32.totalorder %s596_s7, %s592_s13 }
  0x91   :  { %568 = vtanh.f32 %v123_v38  ;;  %v108_v45 = vpop.permute.xlu0 %107 }
  0x92   :  { %v121_v51 = vadd.f32 %v108_v45, %v97_v47  ;;  %p599_p3 = por %p598_p2, %p597_p1 }
  0x93   :  { %v74_v43 = vpop.permute.xlu1 %73 }
  0x94   :  { %v92_v48 = vmul.f32 %v91_v30, %v74_v43  ;;  %p600_p4 = pnand %p599_p3, %p593_p0 }
  0x95   :  { %v154_v0 = vpop.permute.xlu0 %153 }
  0x96   :  { %v96_v53 = vadd.f32 %v92_v48, %v68_v46 }
  0x98   :  { %v113_v50 = vpop.permute.xlu1 %112 }
  0x99   :  { %v122_v52 = vadd.f32 %v113_v50, %v98_v49  ;;  %v144_v6 = vpop.permute.xlu0 %143 }
  0x9b   :  { %570 = vtanh.f32 %v122_v52 }
  0x9c   :  { %v103_v54 = vpop.permute.xlu1 %102  ;;  %572 = vtanh.f32 %v121_v51 }
  0x9d   :  { %v120_v55 = vadd.f32 %v103_v54, %v96_v53  ;;  %v284_v20 = vpop.permute.xlu0 %283 }
  0x9e   :  { %v569_v56 = vpop.eup %568 }
  0x9f   :  { %574 = vtanh.f32 %v120_v55  ;;  %517 = vmatprep.subr.mxu0 %v569_v56 }
  0xa0   :  { %518 = vmatpush3.msra.mxu0 %v569_v56  ;;  %v149_v2 = vpop.permute.xlu1 %148 }
  0xa1   :  { %v274_v28 = vpop.permute.xlu0 %273 }
  0xa4   :  { %v139_v10 = vpop.permute.xlu1 %138 }
  0xa5   :  { %v392_v39 = vpop.permute.xlu0 %391 }
  0xa6   :  { %v397_v40 = vrot.slane %v392_v39, %v66_v26 }
  0xa8   :  { %v571_v57 = vpop.eup %570  ;;  %v279_v23 = vpop.permute.xlu1 %278 }
  0xa9   :  { %519 = vmatprep.subr.mxu0 %v571_v57  ;;  %v573_v58 = vpop.eup %572 }
  0xaa   :  { %520 = vmatpush3.msra.mxu0 %v571_v57 }
  0xab   :  { %521 = vmatprep.subr.mxu0 %v573_v58 }
  0xac   :  { %v575_v59 = vpop.eup %574  ;;  %522 = vmatpush3.msra.mxu0 %v573_v58  ;;  %v269_v32 = vpop.permute.xlu1 %268 }
  0xad   :  { %523 = vmatprep.subr.mxu0 %v575_v59 }
  0xae   :  { %524 = vmatpush3.msra.mxu0 %v575_v59 }
  0xaf   :  { %526 = vmatmul.mubr.msk.f32.vlgmr.msra.gmra.mxu0 %vm156_vm0, %v129_v60  ;;  %545 = vmatprep.subr.mxu0 %v616_v19 }
  0xb0   :  { %528 = vmatprep.mubr.msk.f32.mxu0 %vm156_vm0, %v130_v61 }
  0xb3   :  { %529 = vmatmul.mubr.msk.f32.gmra.mxu0 %vm156_vm0, %v131_v62 }
  0xb4   :  { %553 = vmatprep.mubr.msk.f32.mxu0 %vm617_vm1, %v616_v19 }
 0x16f   :  { %v527_v1 = vpop.f32.mrf.mxu0 }
 0x170   :  { %v241_v8 = vadd.f32 %v527_v1, %v144_v6 }
 0x171   :  { %v235_v3 = vpop.f32.mrf.mxu0 }
 0x172   :  { %v236_v11 = vadd.f32 %v235_v3, %v139_v10 }
 0x173   :  { %v530_v4 = vpop.f32.mrf.mxu0 }
 0x174   :  { %v251_v5 = vadd.f32 %v530_v4, %v154_v0 }
 0x175   :  { %v245_v7 = vpop.f32.mrf.mxu0 }
 0x176   :  { %576 = vtanh.f32 %v251_v5  ;;  %v246_v9 = vadd.f32 %v245_v7, %v149_v2 }
 0x178   :  { %578 = vtanh.f32 %v246_v9 }
 0x179   :  { %580 = vtanh.f32 %v241_v8 }
 0x17a   :  { %582 = vtanh.f32 %v236_v11 }
 0x183   :  { %v577_v12 = vpop.eup %576 }
 0x184   :  { %531 = vmatprep.subr.mxu1 %v577_v12 }
 0x185   :  { %v579_v13 = vpop.eup %578  ;;  %532 = vmatpush3.msra.mxu1 %v577_v12 }
 0x186   :  { %533 = vmatprep.subr.mxu1 %v579_v13  ;;  %v581_v14 = vpop.eup %580 }
 0x187   :  { %534 = vmatpush3.msra.mxu1 %v579_v13  ;;  %v583_v15 = vpop.eup %582 }
 0x188   :  { %535 = vmatprep.subr.mxu1 %v581_v14 }
 0x189   :  { %536 = vmatpush3.msra.mxu1 %v581_v14 }
 0x18a   :  { %537 = vmatprep.subr.mxu1 %v583_v15 }
 0x18b   :  { %538 = vmatpush3.msra.mxu1 %v583_v15 }
 0x18c   :  { %540 = vmatmul.mubr.msk.f32.vlgmr.msra.gmra.mxu1 %vm156_vm0, %v259_v16 }
 0x18d   :  { %542 = vmatprep.mubr.msk.f32.mxu1 %vm156_vm0, %v260_v17 }
 0x190   :  { %543 = vmatmul.mubr.msk.f32.gmra.mxu1 %vm156_vm0, %v261_v18 }
 0x24c   :  { %v541_v21 = vpop.f32.mrf.mxu1 }
 0x24d   :  { %v370_v30 = vadd.f32 %v541_v21, %v274_v28 }
 0x24e   :  { %v364_v24 = vpop.f32.mrf.mxu1 }
 0x24f   :  { %v365_v33 = vadd.f32 %v364_v24, %v269_v32 }
 0x250   :  { %v544_v25 = vpop.f32.mrf.mxu1 }
 0x251   :  { %v380_v27 = vadd.f32 %v544_v25, %v284_v20 }
 0x252   :  { %v374_v29 = vpop.f32.mrf.mxu1 }
 0x253   :  { %584 = vtanh.f32 %v380_v27  ;;  %v375_v31 = vadd.f32 %v374_v29, %v279_v23 }
 0x255   :  { %586 = vtanh.f32 %v375_v31 }
 0x256   :  { %588 = vtanh.f32 %v370_v30 }
 0x257   :  { %590 = vtanh.f32 %v365_v33 }
 0x260   :  { %v585_v34 = vpop.eup %584 }
 0x261   :  { %546 = vmatpush3.msra.mxu0 %v585_v34 }
 0x262   :  { %v587_v35 = vpop.eup %586  ;;  %547 = vmatprep.subr.mxu0 %v616_v19 }
 0x263   :  { %548 = vmatpush3.msra.mxu0 %v587_v35  ;;  %v589_v36 = vpop.eup %588 }
 0x264   :  { %549 = vmatprep.subr.mxu0 %v616_v19  ;;  %v591_v38 = vpop.eup %590 }
 0x265   :  { %550 = vmatpush3.msra.mxu0 %v589_v36 }
 0x266   :  { %551 = vmatprep.subr.mxu0 %v616_v19 }
 0x267   :  { %552 = vmatpush3.msra.mxu0 %v591_v38 }
 0x268   :  { %554 = vmatmul.mubr.msk.f32.vlgmr.msra.gmra.mxu0 %vm156_vm0, %v387_v37 }
 0x328   :  { %v467_v41 = vpop.f32.mrf.mxu0 }
 0x329   :  { %v468_v42 = vadd.f32 %v467_v41, %v397_v40 }
 0x32a   :  { %v555_v43 = vpop.f32.mrf.mxu0 }
 0x32b   :  { %472 = vst.msk [vmem:[#allocation3] sm:$0x1] %vm471_vm2, %v468_v42 }
 0x32c   :  { %603 = shalt.err (!%p600_p4)
}
 0x32d   :  { %482 = dma.vmem_to_hbm [thread:$0]  %s480_s12, 16, %s779_s9, [#allocation4]  }
 0x32e   :  { %612 = dma.done.wait [#allocation4], 16  }
 0x32f   :  { %613 = vsyncadd [#allocation4], 4294967280 }
 0x330   :  { %486 = vsyncpa [#allocation4], 1 }

</bundles_post_ra>
